<compile_context>
chip_gen: v7x
topology: tpu7x:2x2x1
jax: 0.10.0
libtpu: 0.0.40
codegen_flags: <defaults>
</compile_context>

<pallas_src>
import functools
import math

import jax
import jax.numpy as jnp
from jax.experimental import pallas as pl
from jax.experimental.pallas import tpu as pltpu


def _stats_pool_kernel(x_ref, o_ref, sum_ref, ssq_ref, *, t_total, t_tile):
    """One (row-tile, T-tile) block per grid step.

    x_ref:   (tr, t_tile)  input tile (rows = flattened leading dims)
    o_ref:   (tr, 2)       output: col 0 = mean, col 1 = unbiased std
    sum_ref: (tr, 1)       running sum      (f32 VMEM scratch, persists)
    ssq_ref: (tr, 1)       running sum(x^2) (f32 VMEM scratch, persists)
    """
    t_step = pl.program_id(1)

    # Reset the accumulators at the start of every row tile's reduction.
    @pl.when(t_step == 0)
    def _init():
        sum_ref[...] = jnp.zeros_like(sum_ref)
        ssq_ref[...] = jnp.zeros_like(ssq_ref)

    x = x_ref[...].astype(jnp.float32)  # (tr, t_tile)

    # Mask the ragged T tail tile (only emitted when T % t_tile != 0).
    if t_total % t_tile != 0:
        col = jax.lax.broadcasted_iota(jnp.int32, x.shape, 1) + t_step * t_tile
        x = jnp.where(col < t_total, x, 0.0)

    # Cross-lane reductions (XLU); accumulate in f32.
    sum_ref[...] += jnp.sum(x, axis=-1, keepdims=True)
    ssq_ref[...] += jnp.sum(x * x, axis=-1, keepdims=True)

    @pl.when(t_step == pl.num_programs(1) - 1)
    def _finalize():
        n = jnp.float32(t_total)
        s = sum_ref[...]
        mean = s / n
        # unbiased variance: (sum(x^2) - sum(x)^2 / n) / (n - 1)
        var = (ssq_ref[...] - s * mean) / (n - 1.0)
        std = jnp.sqrt(jnp.maximum(var, 0.0))
        o_ref[...] = jnp.concatenate([mean, std], axis=-1).astype(o_ref.dtype)


def stats_pooling(x, *, r_tile=256, t_tile=2048):
    """Forward pass of StatsPoolingLayer.

    x: (..., T)  ->  (..., 2) with [..., 0] = mean, [..., 1] = unbiased std,
    matching torch.stack([x.mean(-1), x.std(-1, unbiased=True)], dim=-1).
    """
    *lead, t = x.shape
    r = math.prod(lead) if lead else 1

    # Free metadata reshape (row-major): no transpose, no HBM copy.
    x2 = x.reshape(r, t)

    # Row tiles: multiples of 8 sublanes (or the full row extent when small).
    tr = r if r <= r_tile else r_tile
    # T tiles: lane-aligned (or the full sequence when short).
    tt = t if t <= t_tile else t_tile

    num_r = pl.cdiv(r, tr)
    num_t = pl.cdiv(t, tt)

    out = pl.pallas_call(
        functools.partial(_stats_pool_kernel, t_total=t, t_tile=tt),
        out_shape=jax.ShapeDtypeStruct((r, 2), x.dtype),
        grid_spec=pltpu.PrefetchScalarGridSpec(
            num_scalar_prefetch=0,
            grid=(num_r, num_t),
            in_specs=[pl.BlockSpec((tr, tt), lambda i, j: (i, j))],
            out_specs=pl.BlockSpec((tr, 2), lambda i, j: (i, 0)),
            scratch_shapes=[
                pltpu.VMEM((tr, 1), jnp.float32),  # running sum
                pltpu.VMEM((tr, 1), jnp.float32),  # running sum of squares
            ],
        ),
        compiler_params=pltpu.CompilerParams(
            # rows are independent (megacore-shardable); T is the reduction.
            dimension_semantics=("parallel", "arbitrary"),
        ),
    )(x2)

    return out.reshape(*lead, 2)


if __name__ == "__main__":
    # Small shapes consistent with the module: (batch, channels, time).
    N, C, T = 2, 32, 16

    key = jax.random.PRNGKey(0)
    x = jax.random.normal(key, (N, C, T), jnp.float32)

    out = stats_pooling(x)
    out = jax.block_until_ready(out)

    # Pure-JAX reference matching torch semantics (unbiased std, ddof=1).
    mean_ref = jnp.mean(x, axis=-1)
    std_ref = jnp.std(x, axis=-1, ddof=1)
    ref = jnp.stack([mean_ref, std_ref], axis=-1)

    assert out.shape == ref.shape, (out.shape, ref.shape)
    assert jnp.allclose(out, ref, atol=1e-4, rtol=1e-4), "mismatch vs reference"

    print("KERNEL_OK")
</pallas_src>

<mosaic_0001>
module attributes {stable_mosaic.version = 11 : i64} {
  func.func @_stats_pool_kernel(%arg0: i32, %arg1: i32, %arg2: memref<64x16xf32, #tpu.memory_space<vmem>>, %arg3: memref<64x2xf32, #tpu.memory_space<vmem>>, %arg4: memref<64x1xf32, #tpu.memory_space<vmem>>, %arg5: memref<64x1xf32, #tpu.memory_space<vmem>>) attributes {dimension_semantics = [#tpu.dimension_semantics<parallel>, #tpu.dimension_semantics<arbitrary>], iteration_bounds = array<i64: 1, 1>, scalar_prefetch = 0 : i64, scratch_operands = 2 : i64, tpu.core_type = #tpu.core_type<tc>, window_params = [{transform_indices = @transform_0, window_bounds = array<i64: 64, 16>}, {transform_indices = @transform_1, window_bounds = array<i64: 64, 2>}]} {
    %c0_i32 = arith.constant 0 : i32
    %0 = arith.cmpi eq, %arg1, %c0_i32 : i32
    %1 = arith.extui %0 : i1 to i32
    %c0_i32_0 = arith.constant 0 : i32
    %2 = arith.cmpi ne, %1, %c0_i32_0 : i32
    scf.if %2 {
      %cst_13 = arith.constant 0.000000e+00 : f32
      %18 = vector.broadcast %cst_13 : f32 to vector<64x1xf32>
      %c0_14 = arith.constant 0 : index
      %c0_15 = arith.constant 0 : index
      %19 = vector.load %arg4[%c0_14, %c0_15] : memref<64x1xf32, #tpu.memory_space<vmem>>, vector<64x1xf32>
      tpu.vector_store %arg4[%c0_14, %c0_15], %18 {strides = array<i32>} : memref<64x1xf32, #tpu.memory_space<vmem>>, vector<64x1xf32>,
      %cst_16 = arith.constant 0.000000e+00 : f32
      %20 = vector.broadcast %cst_16 : f32 to vector<64x1xf32>
      %c0_17 = arith.constant 0 : index
      %c0_18 = arith.constant 0 : index
      %21 = vector.load %arg5[%c0_17, %c0_18] : memref<64x1xf32, #tpu.memory_space<vmem>>, vector<64x1xf32>
      tpu.vector_store %arg5[%c0_17, %c0_18], %20 {strides = array<i32>} : memref<64x1xf32, #tpu.memory_space<vmem>>, vector<64x1xf32>,
    } else {
    }
    %c0 = arith.constant 0 : index
    %c0_1 = arith.constant 0 : index
    %3 = vector.load %arg2[%c0, %c0_1] : memref<64x16xf32, #tpu.memory_space<vmem>>, vector<64x16xf32>
    %c0_2 = arith.constant 0 : index
    %c0_3 = arith.constant 0 : index
    %4 = vector.load %arg4[%c0_2, %c0_3] : memref<64x1xf32, #tpu.memory_space<vmem>>, vector<64x1xf32>
    %cst = arith.constant dense<0.000000e+00> : vector<64xf32>
    %5 = vector.multi_reduction <add>, %3, %cst [1] : vector<64x16xf32> to vector<64xf32>
    %6 = vector.shape_cast %5 : vector<64xf32> to vector<64x1xf32>
    %7 = arith.addf %4, %6 : vector<64x1xf32>
    %c0_4 = arith.constant 0 : index
    %c0_5 = arith.constant 0 : index
    %8 = vector.load %arg4[%c0_4, %c0_5] : memref<64x1xf32, #tpu.memory_space<vmem>>, vector<64x1xf32>
    tpu.vector_store %arg4[%c0_4, %c0_5], %7 {strides = array<i32>} : memref<64x1xf32, #tpu.memory_space<vmem>>, vector<64x1xf32>,
    %c0_6 = arith.constant 0 : index
    %c0_7 = arith.constant 0 : index
    %9 = vector.load %arg5[%c0_6, %c0_7] : memref<64x1xf32, #tpu.memory_space<vmem>>, vector<64x1xf32>
    %10 = arith.mulf %3, %3 : vector<64x16xf32>
    %cst_8 = arith.constant dense<0.000000e+00> : vector<64xf32>
    %11 = vector.multi_reduction <add>, %10, %cst_8 [1] : vector<64x16xf32> to vector<64xf32>
    %12 = vector.shape_cast %11 : vector<64xf32> to vector<64x1xf32>
    %13 = arith.addf %9, %12 : vector<64x1xf32>
    %c0_9 = arith.constant 0 : index
    %c0_10 = arith.constant 0 : index
    %14 = vector.load %arg5[%c0_9, %c0_10] : memref<64x1xf32, #tpu.memory_space<vmem>>, vector<64x1xf32>
    tpu.vector_store %arg5[%c0_9, %c0_10], %13 {strides = array<i32>} : memref<64x1xf32, #tpu.memory_space<vmem>>, vector<64x1xf32>,
    %c0_i32_11 = arith.constant 0 : i32
    %15 = arith.cmpi eq, %arg1, %c0_i32_11 : i32
    %16 = arith.extui %15 : i1 to i32
    %c0_i32_12 = arith.constant 0 : i32
    %17 = arith.cmpi ne, %16, %c0_i32_12 : i32
    scf.if %17 {
      %c0_13 = arith.constant 0 : index
      %c0_14 = arith.constant 0 : index
      %18 = vector.load %arg4[%c0_13, %c0_14] : memref<64x1xf32, #tpu.memory_space<vmem>>, vector<64x1xf32>
      %cst_15 = arith.constant 1.600000e+01 : f32
      %19 = vector.broadcast %cst_15 : f32 to vector<64x1xf32>
      %20 = arith.divf %18, %19 : vector<64x1xf32>
      %c0_16 = arith.constant 0 : index
      %c0_17 = arith.constant 0 : index
      %21 = vector.load %arg5[%c0_16, %c0_17] : memref<64x1xf32, #tpu.memory_space<vmem>>, vector<64x1xf32>
      %22 = arith.mulf %18, %20 : vector<64x1xf32>
      %23 = arith.subf %21, %22 : vector<64x1xf32>
      %cst_18 = arith.constant 1.600000e+01 : f32
      %cst_19 = arith.constant 1.000000e+00 : f32
      %24 = arith.subf %cst_18, %cst_19 : f32
      %25 = vector.broadcast %24 : f32 to vector<64x1xf32>
      %26 = arith.divf %23, %25 : vector<64x1xf32>
      %cst_20 = arith.constant 0.000000e+00 : f32
      %27 = vector.broadcast %cst_20 : f32 to vector<64x1xf32>
      %28 = arith.maximumf %26, %27 : vector<64x1xf32>
      %29 = math.sqrt %28 : vector<64x1xf32>
      %30 = tpu.concatenate %20, %29 in 1 : vector<64x1xf32>, vector<64x1xf32> -> vector<64x2xf32>
      %c0_21 = arith.constant 0 : index
      %c0_22 = arith.constant 0 : index
      %31 = vector.load %arg3[%c0_21, %c0_22] : memref<64x2xf32, #tpu.memory_space<vmem>>, vector<64x2xf32>
      tpu.vector_store %arg3[%c0_21, %c0_22], %30 {strides = array<i32>} : memref<64x2xf32, #tpu.memory_space<vmem>>, vector<64x2xf32>,
    } else {
    }
    return
  }
  func.func @transform_0(%arg0: i32, %arg1: i32) -> (i32, i32) {
    %c0_i32 = arith.constant 0 : i32
    return %arg0, %arg1 : i32, i32
  }
  func.func @transform_1(%arg0: i32, %arg1: i32) -> (i32, i32) {
    %c0_i32 = arith.constant 0 : i32
    %c0_i32_0 = arith.constant 0 : i32
    return %arg0, %c0_i32 : i32, i32
  }
}

</mosaic_0001>

<bundles_post_ra>
// kernel: tpu_custom_call.1
= control target key start
LH: loop header
LB: loop body
LE: loop exit
PB: predicated region body
PF: predicated region fallthrough
CT: control target
= control target key end

     0   :  { %vm45_vm0 = vcmask 130048   ;;  %vm12_vm1 = vcmask 7168   ;;  %v331_v3 = vmov 0.0   ;;  %s503_s0 = inlined_call_operand.vmem [shape: f32[64,16], index: 0, kind: input, shape index: {}]   ;;  %s504_s1 = inlined_call_operand.vmem [shape: f32[64,2], index: 1, kind: output, shape index: {}]  }
   0x1   :  { %v31_v0 = vld [vmem:[%s503_s0 + $0x10] sm:$0xff]  ;;  %v29_v1 = vld [vmem:[%s503_s0] sm:$0xff]  ;;  %v32_v2 = vld [vmem:[%s503_s0 + $0x18] sm:$0xff]  ;;  %15 = vst.msk [vmem:[#allocation2 + $0x10] sm:$0xff] %vm12_vm1, %v331_v3 }
   0x2   :  { %13 = vst.msk [vmem:[#allocation2] sm:$0xff] %vm12_vm1, %v331_v3  ;;  %14 = vst.msk [vmem:[#allocation2 + $0x8] sm:$0xff] %vm12_vm1, %v331_v3  ;;  %v52_v4 = vsel %vm45_vm0, %v31_v0, 0.0  ;;  %v46_v5 = vsel %vm45_vm0, %v29_v1, 0.0  ;;  %v30_v6 = vld [vmem:[%s503_s0 + $0x8] sm:$0xff]  ;;  %v55_v7 = vsel %vm45_vm0, %v32_v2, 0.0  ;;  %v95_v15 = vmul.f32 %v29_v1, %v29_v1 }
   0x3   :  { %16 = vst.msk [vmem:[#allocation2 + $0x18] sm:$0xff] %vm12_vm1, %v331_v3  ;;  %17 = vst.msk [vmem:[#allocation2 + $0x20] sm:$0xff] %vm12_vm1, %v331_v3  ;;  %53 = vadd.xlane.f32.xlu1 %v52_v4  ;;  %47 = vadd.xlane.f32.xlu0 %v46_v5  ;;  %v49_v8 = vsel %vm45_vm0, %v30_v6, 0.0  ;;  %v34_v9 = vld [vmem:[%s503_s0 + $0x28] sm:$0xff]  ;;  %v33_v10 = vld [vmem:[%s503_s0 + $0x20] sm:$0xff]  ;;  %v96_v18 = vmul.f32 %v30_v6, %v30_v6  ;;  %v97_v19 = vmul.f32 %v31_v0, %v31_v0 }
   0x4   :  { %18 = vst.msk [vmem:[#allocation2 + $0x28] sm:$0xff] %vm12_vm1, %v331_v3  ;;  %19 = vst.msk [vmem:[#allocation2 + $0x30] sm:$0xff] %vm12_vm1, %v331_v3  ;;  %v61_v11 = vsel %vm45_vm0, %v34_v9, 0.0  ;;  %v58_v12 = vsel %vm45_vm0, %v33_v10, 0.0  ;;  %v36_v13 = vld [vmem:[%s503_s0 + $0x38] sm:$0xff]  ;;  %v35_v14 = vld [vmem:[%s503_s0 + $0x30] sm:$0xff]  ;;  %v98_v22 = vmul.f32 %v32_v2, %v32_v2  ;;  %v100_v25 = vmul.f32 %v34_v9, %v34_v9 }
   0x5   :  { %20 = vst.msk [vmem:[#allocation2 + $0x38] sm:$0xff] %vm12_vm1, %v331_v3  ;;  %21 = vst.msk [vmem:[#allocation3] sm:$0xff] %vm12_vm1, %v331_v3  ;;  %v67_v16 = vsel %vm45_vm0, %v36_v13, 0.0  ;;  %v64_v17 = vsel %vm45_vm0, %v35_v14, 0.0  ;;  %v106_v20 = vsel %vm45_vm0, %v96_v18, 0.0  ;;  %v103_v21 = vsel %vm45_vm0, %v95_v15, 0.0 }
   0x6   :  { %22 = vst.msk [vmem:[#allocation3 + $0x8] sm:$0xff] %vm12_vm1, %v331_v3  ;;  %23 = vst.msk [vmem:[#allocation3 + $0x10] sm:$0xff] %vm12_vm1, %v331_v3  ;;  %v112_v23 = vsel %vm45_vm0, %v98_v22, 0.0  ;;  %v109_v24 = vsel %vm45_vm0, %v97_v19, 0.0  ;;  %v99_v26 = vmul.f32 %v33_v10, %v33_v10  ;;  %v118_v27 = vsel %vm45_vm0, %v100_v25, 0.0  ;;  %s332_s0 = smov 1  }
   0x7   :  { %24 = vst.msk [vmem:[#allocation3 + $0x18] sm:$0xff] %vm12_vm1, %v331_v3  ;;  %25 = vst.msk [vmem:[#allocation3 + $0x20] sm:$0xff] %vm12_vm1, %v331_v3  ;;  %56 = vadd.xlane.f32.xlu1 %v55_v7  ;;  %50 = vadd.xlane.f32.xlu0 %v49_v8  ;;  %v102_v29 = vmul.f32 %v36_v13, %v36_v13  ;;  %v101_v30 = vmul.f32 %v35_v14, %v35_v14 }
   0x8   :  { %26 = vst.msk [vmem:[#allocation3 + $0x28] sm:$0xff] %vm12_vm1, %v331_v3  ;;  %27 = vst.msk [vmem:[#allocation3 + $0x30] sm:$0xff] %vm12_vm1, %v331_v3  ;;  %v115_v28 = vsel %vm45_vm0, %v99_v26, 0.0  ;;  %v39_v33 = vld [vmem:[#allocation2 + $0x10] sm:$0xff] }
   0x9   :  { %28 = vst.msk [vmem:[#allocation3 + $0x38] sm:$0xff] %vm12_vm1, %v331_v3  ;;  %v124_v31 = vsel %vm45_vm0, %v102_v29, 0.0  ;;  %v121_v32 = vsel %vm45_vm0, %v101_v30, 0.0  ;;  %v37_v34 = vld [vmem:[#allocation2] sm:$0xff]  ;;  %v38_v40 = vld [vmem:[#allocation2 + $0x8] sm:$0xff] }
   0xa   :  { %v40_v39 = vld [vmem:[#allocation2 + $0x18] sm:$0xff]  ;;  %v41_v46 = vld [vmem:[#allocation2 + $0x20] sm:$0xff] }
   0xb   :  { %62 = vadd.xlane.f32.xlu1 %v61_v11  ;;  %59 = vadd.xlane.f32.xlu0 %v58_v12  ;;  %v42_v45 = vld [vmem:[#allocation2 + $0x28] sm:$0xff]  ;;  %v43_v52 = vld [vmem:[#allocation2 + $0x30] sm:$0xff] }
   0xc   :  { %v44_v51 = vld [vmem:[#allocation2 + $0x38] sm:$0xff]  ;;  %v87_v58 = vld [vmem:[#allocation3] sm:$0xff] }
   0xd   :  { %v88_v57 = vld [vmem:[#allocation3 + $0x8] sm:$0xff]  ;;  %v89_v0 = vld [vmem:[#allocation3 + $0x10] sm:$0xff] }
   0xe   :  { %v90_v63 = vld [vmem:[#allocation3 + $0x18] sm:$0xff]  ;;  %v91_v12 = vld [vmem:[#allocation3 + $0x20] sm:$0xff] }
   0xf   :  { %68 = vadd.xlane.f32.xlu1 %v67_v16  ;;  %65 = vadd.xlane.f32.xlu0 %v64_v17  ;;  %v92_v11 = vld [vmem:[#allocation3 + $0x28] sm:$0xff] }
  0x10   :  { %v94_v19 = vld [vmem:[#allocation3 + $0x38] sm:$0xff] }
  0x13   :  { %107 = vadd.xlane.f32.xlu1 %v106_v20  ;;  %104 = vadd.xlane.f32.xlu0 %v103_v21 }
  0x17   :  { %113 = vadd.xlane.f32.xlu1 %v112_v23  ;;  %110 = vadd.xlane.f32.xlu0 %v109_v24  ;;  %v93_v24 = vld [vmem:[#allocation3 + $0x30] sm:$0xff] }
  0x1b   :  { %119 = vadd.xlane.f32.xlu1 %v118_v27  ;;  %116 = vadd.xlane.f32.xlu0 %v115_v28 }
  0x1f   :  { %125 = vadd.xlane.f32.xlu1 %v124_v31  ;;  %122 = vadd.xlane.f32.xlu0 %v121_v32 }
  0x90   :  { %v54_v35 = vpop.xlane.xlu1 %53  ;;  %v48_v36 = vpop.xlane.xlu0 %47 }
  0x91   :  { %v72_v37 = vadd.f32 %v54_v35, %v39_v33  ;;  %v70_v38 = vadd.f32 %v48_v36, %v37_v34 }
  0x93   :  { %81 = vst.msk [vmem:[#allocation2 + $0x10] sm:$0xff] %vm12_vm1, %v72_v37  ;;  %79 = vst.msk [vmem:[#allocation2] sm:$0xff] %vm12_vm1, %v70_v38 }
  0x94   :  { %v57_v41 = vpop.xlane.xlu1 %56  ;;  %v51_v42 = vpop.xlane.xlu0 %50 }
  0x95   :  { %v73_v43 = vadd.f32 %v57_v41, %v40_v39  ;;  %v71_v44 = vadd.f32 %v51_v42, %v38_v40 }
  0x97   :  { %82 = vst.msk [vmem:[#allocation2 + $0x18] sm:$0xff] %vm12_vm1, %v73_v43  ;;  %80 = vst.msk [vmem:[#allocation2 + $0x8] sm:$0xff] %vm12_vm1, %v71_v44 }
  0x98   :  { %v63_v47 = vpop.xlane.xlu1 %62  ;;  %v60_v48 = vpop.xlane.xlu0 %59 }
  0x99   :  { %v75_v49 = vadd.f32 %v63_v47, %v42_v45  ;;  %v74_v50 = vadd.f32 %v60_v48, %v41_v46 }
  0x9a   :  { %v146_v2 = vld [vmem:[#allocation2] sm:$0xff]  ;;  %v148_v9 = vld [vmem:[#allocation2 + $0x10] sm:$0xff] }
  0x9b   :  { %84 = vst.msk [vmem:[#allocation2 + $0x28] sm:$0xff] %vm12_vm1, %v75_v49  ;;  %83 = vst.msk [vmem:[#allocation2 + $0x20] sm:$0xff] %vm12_vm1, %v74_v50  ;;  %v411_v8 = vmul.f32 0.0625, %v146_v2  ;;  %v415_v15 = vmul.f32 0.0625, %v148_v9 }
  0x9c   :  { %v69_v53 = vpop.xlane.xlu1 %68  ;;  %v66_v54 = vpop.xlane.xlu0 %65 }
  0x9d   :  { %v77_v55 = vadd.f32 %v69_v53, %v44_v51  ;;  %v76_v56 = vadd.f32 %v66_v54, %v43_v52  ;;  %v171_v21 = vmul.f32 %v411_v8, %v146_v2  ;;  %v173_v31 = vmul.f32 %v415_v15, %v148_v9 }
  0x9e   :  { %v147_v1 = vld [vmem:[#allocation2 + $0x8] sm:$0xff]  ;;  %v149_v10 = vld [vmem:[#allocation2 + $0x18] sm:$0xff] }
  0x9f   :  { %86 = vst.msk [vmem:[#allocation2 + $0x38] sm:$0xff] %vm12_vm1, %v77_v55  ;;  %85 = vst.msk [vmem:[#allocation2 + $0x30] sm:$0xff] %vm12_vm1, %v76_v56  ;;  %v409_v7 = vmul.f32 0.0625, %v147_v1  ;;  %v417_v16 = vmul.f32 0.0625, %v149_v10 }
  0xa0   :  { %v108_v59 = vpop.xlane.xlu1 %107  ;;  %v105_v60 = vpop.xlane.xlu0 %104 }
  0xa1   :  { %v128_v61 = vadd.f32 %v108_v59, %v88_v57  ;;  %v127_v62 = vadd.f32 %v105_v60, %v87_v58  ;;  %v172_v20 = vmul.f32 %v409_v7, %v147_v1  ;;  %v174_v32 = vmul.f32 %v417_v16, %v149_v10 }
  0xa2   :  { %v150_v22 = vld [vmem:[#allocation2 + $0x20] sm:$0xff]  ;;  %v151_v23 = vld [vmem:[#allocation2 + $0x28] sm:$0xff] }
  0xa3   :  { %136 = vst.msk [vmem:[#allocation3 + $0x8] sm:$0xff] %vm12_vm1, %v128_v61  ;;  %135 = vst.msk [vmem:[#allocation3] sm:$0xff] %vm12_vm1, %v127_v62  ;;  %v425_v33 = vmul.f32 0.0625, %v150_v22  ;;  %v427_v34 = vmul.f32 0.0625, %v151_v23 }
  0xa4   :  { %v114_v3 = vpop.xlane.xlu1 %113  ;;  %v111_v4 = vpop.xlane.xlu0 %110 }
  0xa5   :  { %v130_v5 = vadd.f32 %v114_v3, %v90_v63  ;;  %v129_v6 = vadd.f32 %v111_v4, %v89_v0  ;;  %v175_v47 = vmul.f32 %v425_v33, %v150_v22  ;;  %v176_v48 = vmul.f32 %v427_v34, %v151_v23 }
  0xa6   :  { %v152_v45 = vld [vmem:[#allocation2 + $0x30] sm:$0xff]  ;;  %v153_v46 = vld [vmem:[#allocation2 + $0x38] sm:$0xff] }
  0xa7   :  { %138 = vst.msk [vmem:[#allocation3 + $0x18] sm:$0xff] %vm12_vm1, %v130_v5  ;;  %137 = vst.msk [vmem:[#allocation3 + $0x10] sm:$0xff] %vm12_vm1, %v129_v6  ;;  %v433_v51 = vmul.f32 0.0625, %v152_v45  ;;  %v435_v52 = vmul.f32 0.0625, %v153_v46 }
  0xa8   :  { %v120_v13 = vpop.xlane.xlu1 %119  ;;  %v117_v14 = vpop.xlane.xlu0 %116 }
  0xa9   :  { %v132_v17 = vadd.f32 %v120_v13, %v92_v11  ;;  %v131_v18 = vadd.f32 %v117_v14, %v91_v12  ;;  %v177_v63 = vmul.f32 %v433_v51, %v152_v45  ;;  %v178_v0 = vmul.f32 %v435_v52, %v153_v46 }
  0xaa   :  { %v164_v25 = vld [vmem:[#allocation3 + $0x8] sm:$0xff]  ;;  %v163_v26 = vld [vmem:[#allocation3] sm:$0xff] }
  0xab   :  { %140 = vst.msk [vmem:[#allocation3 + $0x28] sm:$0xff] %vm12_vm1, %v132_v17  ;;  %139 = vst.msk [vmem:[#allocation3 + $0x20] sm:$0xff] %vm12_vm1, %v131_v18  ;;  %v180_v27 = vsub.f32 %v164_v25, %v172_v20  ;;  %v179_v28 = vsub.f32 %v163_v26, %v171_v21 }
  0xac   :  { %v126_v29 = vpop.xlane.xlu1 %125  ;;  %v123_v30 = vpop.xlane.xlu0 %122 }
  0xad   :  { %v134_v35 = vadd.f32 %v126_v29, %v94_v19  ;;  %v133_v36 = vadd.f32 %v123_v30, %v93_v24  ;;  %v189_v37 = vmul.f32 0.06666667, %v180_v27  ;;  %v188_v38 = vmul.f32 0.06666667, %v179_v28 }
  0xae   :  { %v165_v39 = vld [vmem:[#allocation3 + $0x10] sm:$0xff]  ;;  %v166_v40 = vld [vmem:[#allocation3 + $0x18] sm:$0xff] }
  0xaf   :  { %142 = vst.msk [vmem:[#allocation3 + $0x38] sm:$0xff] %vm12_vm1, %v134_v35  ;;  %141 = vst.msk [vmem:[#allocation3 + $0x30] sm:$0xff] %vm12_vm1, %v133_v36  ;;  %v197_v41 = vmax.f32 %v189_v37, 0.0  ;;  %v196_v42 = vmax.f32 %v188_v38, 0.0  ;;  %v181_v43 = vsub.f32 %v165_v39, %v173_v31  ;;  %v182_v44 = vsub.f32 %v166_v40, %v174_v32 }
  0xb1   :  { %315 = vrsqrt.f32 %v197_v41  ;;  %v190_v53 = vmul.f32 0.06666667, %v181_v43  ;;  %v191_v54 = vmul.f32 0.06666667, %v182_v44  ;;  %vm213_vm2 = vcmp.eq.f32.partialorder %v197_v41, inf }
  0xb2   :  { %317 = vrsqrt.f32 %v196_v42  ;;  %v167_v49 = vld [vmem:[#allocation3 + $0x20] sm:$0xff]  ;;  %v168_v50 = vld [vmem:[#allocation3 + $0x28] sm:$0xff]  ;;  %vm215_vm3 = vcmp.eq.f32.partialorder %v197_v41, 0.0  ;;  %v216_v10 = vand.u32 2147483648, %v197_v41  ;;  %vm206_vm4 = vcmp.eq.f32.partialorder %v196_v42, inf }
  0xb3   :  { %v183_v55 = vsub.f32 %v167_v49, %v175_v47  ;;  %v184_v56 = vsub.f32 %v168_v50, %v176_v48  ;;  %v198_v57 = vmax.f32 %v190_v53, 0.0  ;;  %v199_v58 = vmax.f32 %v191_v54, 0.0 }
  0xb4   :  { %vm208_vm5 = vcmp.eq.f32.partialorder %v196_v42, 0.0  ;;  %v209_v17 = vand.u32 2147483648, %v196_v42 }
  0xb5   :  { %v192_v59 = vmul.f32 0.06666667, %v183_v55  ;;  %v193_v60 = vmul.f32 0.06666667, %v184_v56  ;;  %319 = vrsqrt.f32 %v198_v57  ;;  %vm220_vm6 = vcmp.eq.f32.partialorder %v198_v57, inf }
  0xb6   :  { %v169_v61 = vld [vmem:[#allocation3 + $0x30] sm:$0xff]  ;;  %v170_v62 = vld [vmem:[#allocation3 + $0x38] sm:$0xff]  ;;  %321 = vrsqrt.f32 %v199_v58  ;;  %v223_v26 = vand.u32 2147483648, %v198_v57  ;;  %vm222_vm7 = vcmp.eq.f32.partialorder %v198_v57, 0.0  ;;  %vm227_vm8 = vcmp.eq.f32.partialorder %v199_v58, inf }
  0xb7   :  { %v200_v1 = vmax.f32 %v192_v59, 0.0  ;;  %v439_v2 = vmax.f32 %v193_v60, 0.0  ;;  %v185_v3 = vsub.f32 %v169_v61, %v177_v63  ;;  %v186_v4 = vsub.f32 %v170_v62, %v178_v0 }
  0xb8   :  { %v230_v36 = vand.u32 2147483648, %v199_v58  ;;  %vm229_vm10 = vcmp.eq.f32.partialorder %v199_v58, 0.0 }
  0xb9   :  { %323 = vrsqrt.f32 %v200_v1  ;;  %v194_v12 = vmul.f32 0.06666667, %v185_v3  ;;  %v195_v13 = vmul.f32 0.06666667, %v186_v4  ;;  %vm234_vm9 = vcmp.eq.f32.partialorder %v200_v1, inf }
  0xba   :  { %325 = vrsqrt.f32 %v439_v2  ;;  %v237_v37 = vand.u32 2147483648, %v200_v1  ;;  %vm236_vm11 = vcmp.eq.f32.partialorder %v200_v1, 0.0  ;;  %vm241_vm12 = vcmp.eq.f32.partialorder %v439_v2, inf }
  0xbb   :  { %v316_v5 = vpop.eup %315  ;;  %v202_v20 = vmax.f32 %v194_v12, 0.0  ;;  %v203_v21 = vmax.f32 %v195_v13, 0.0  ;;  %v244_v44 = vand.u32 2147483648, %v439_v2  ;;  %vm243_vm13 = vcmp.eq.f32.partialorder %v439_v2, 0.0 }
  0xbc   :  { %v318_v6 = vpop.eup %317  ;;  %v212_v9 = vmul.f32 %v316_v5, %v197_v41 }
  0xbd   :  { %v205_v11 = vmul.f32 %v318_v6, %v196_v42  ;;  %327 = vrsqrt.f32 %v202_v20  ;;  %vm248_vm14 = vcmp.eq.f32.partialorder %v202_v20, inf  ;;  %v251_v48 = vand.u32 2147483648, %v202_v20 }
  0xbe   :  { %v214_v14 = vsel %vm213_vm2, %v197_v41, %v212_v9  ;;  %329 = vrsqrt.f32 %v203_v21  ;;  %vm250_vm15 = vcmp.eq.f32.partialorder %v202_v20, 0.0  ;;  %vm255_vm0 = vcmp.eq.f32.partialorder %v203_v21, inf }
  0xbf   :  { %v217_v18 = vsel %vm215_vm3, %v216_v10, %v214_v14  ;;  %v207_v19 = vsel %vm206_vm4, %v196_v42, %v205_v11  ;;  %v320_v23 = vpop.eup %319  ;;  %v258_v55 = vand.u32 2147483648, %v203_v21  ;;  %vm257_vm2 = vcmp.eq.f32.partialorder %v203_v21, 0.0 }
  0xc0   :  { %270 = vrot.lane.b32.xlu1 %v217_v18, %s332_s0  ;;  %v210_v22 = vsel %vm208_vm5, %v209_v17, %v207_v19  ;;  %v322_v24 = vpop.eup %321  ;;  %v219_v25 = vmul.f32 %v320_v23, %v198_v57  ;;  %vm300_vm3 = vcmask 15360  }
  0xc1   :  { %268 = vrot.lane.b32.xlu0 %v210_v22, %s332_s0  ;;  %v226_v27 = vmul.f32 %v322_v24, %v199_v58 }
  0xc2   :  { %v221_v28 = vsel %vm220_vm6, %v198_v57, %v219_v25 }
  0xc3   :  { %v324_v29 = vpop.eup %323  ;;  %v224_v30 = vsel %vm222_vm7, %v223_v26, %v221_v28  ;;  %v228_v32 = vsel %vm227_vm8, %v199_v58, %v226_v27 }
  0xc4   :  { %v326_v31 = vpop.eup %325  ;;  %272 = vrot.lane.b32.xlu1 %v224_v30, %s332_s0  ;;  %v233_v35 = vmul.f32 %v324_v29, %v200_v1  ;;  %v231_v40 = vsel %vm229_vm10, %v230_v36, %v228_v32 }
  0xc5   :  { %v240_v38 = vmul.f32 %v326_v31, %v439_v2 }
  0xc6   :  { %v235_v39 = vsel %vm234_vm9, %v200_v1, %v233_v35 }
  0xc7   :  { %v238_v41 = vsel %vm236_vm11, %v237_v37, %v235_v39  ;;  %v242_v42 = vsel %vm241_vm12, %v439_v2, %v240_v38  ;;  %v328_v43 = vpop.eup %327 }
  0xc8   :  { %274 = vrot.lane.b32.xlu1 %v231_v40, %s332_s0  ;;  %276 = vrot.lane.b32.xlu0 %v238_v41, %s332_s0  ;;  %v330_v45 = vpop.eup %329  ;;  %v247_v46 = vmul.f32 %v328_v43, %v202_v20  ;;  %v245_v47 = vsel %vm243_vm13, %v244_v44, %v242_v42 }
  0xc9   :  { %v254_v49 = vmul.f32 %v330_v45, %v203_v21 }
  0xca   :  { %v249_v50 = vsel %vm248_vm14, %v202_v20, %v247_v46 }
  0xcb   :  { %v252_v53 = vsel %vm250_vm15, %v251_v48, %v249_v50  ;;  %v256_v54 = vsel %vm255_vm0, %v203_v21, %v254_v49 }
  0xcc   :  { %278 = vrot.lane.b32.xlu1 %v245_v47, %s332_s0  ;;  %280 = vrot.lane.b32.xlu0 %v252_v53, %s332_s0  ;;  %v259_v56 = vsel %vm257_vm2, %v258_v55, %v256_v54 }
  0xd0   :  { %282 = vrot.lane.b32.xlu1 %v259_v56, %s332_s0 }
 0x132   :  { %v271_v57 = vpop.permute.xlu1 %270 }
 0x133   :  { %v293_v58 = vsel %vm12_vm1, %v409_v7, %v271_v57  ;;  %v269_v59 = vpop.permute.xlu0 %268 }
 0x134   :  { %302 = vst.msk [vmem:[%s504_s1 + $0x8] sm:$0xff] %vm300_vm3, %v293_v58  ;;  %v292_v60 = vsel %vm12_vm1, %v411_v8, %v269_v59 }
 0x135   :  { %301 = vst.msk [vmem:[%s504_s1] sm:$0xff] %vm300_vm3, %v292_v60 }
 0x136   :  { %v273_v61 = vpop.permute.xlu1 %272 }
 0x137   :  { %v294_v62 = vsel %vm12_vm1, %v415_v15, %v273_v61 }
 0x138   :  { %303 = vst.msk [vmem:[%s504_s1 + $0x10] sm:$0xff] %vm300_vm3, %v294_v62 }
 0x13a   :  { %v275_v7 = vpop.permute.xlu1 %274  ;;  %v277_v63 = vpop.permute.xlu0 %276 }
 0x13b   :  { %v295_v0 = vsel %vm12_vm1, %v417_v16, %v275_v7  ;;  %v296_v8 = vsel %vm12_vm1, %v425_v33, %v277_v63 }
 0x13c   :  { %304 = vst.msk [vmem:[%s504_s1 + $0x18] sm:$0xff] %vm300_vm3, %v295_v0  ;;  %305 = vst.msk [vmem:[%s504_s1 + $0x20] sm:$0xff] %vm300_vm3, %v296_v8 }
 0x13e   :  { %v279_v15 = vpop.permute.xlu1 %278  ;;  %v281_v16 = vpop.permute.xlu0 %280 }
 0x13f   :  { %v297_v1 = vsel %vm12_vm1, %v427_v34, %v279_v15  ;;  %v298_v33 = vsel %vm12_vm1, %v433_v51, %v281_v16 }
 0x140   :  { %306 = vst.msk [vmem:[%s504_s1 + $0x28] sm:$0xff] %vm300_vm3, %v297_v1  ;;  %307 = vst.msk [vmem:[%s504_s1 + $0x30] sm:$0xff] %vm300_vm3, %v298_v33 }
 0x142   :  { %v283_v2 = vpop.permute.xlu1 %282 }
 0x143   :  { %v299_v3 = vsel %vm12_vm1, %v435_v52, %v283_v2 }
 0x144   :  { %308 = vst.msk [vmem:[%s504_s1 + $0x38] sm:$0xff] %vm300_vm3, %v299_v3 }

</bundles_post_ra>
